<compile_context>
chip_gen: v7x
topology: tpu7x:2x2x1
jax: 0.10.0
libtpu: 0.0.40
codegen_flags: <defaults>
</compile_context>

<pallas_src>
import functools

import jax
import jax.numpy as jnp
from jax.experimental import pallas as pl
from jax.experimental.pallas import tpu as pltpu


_UNRESOLVED = object()


def _round_up(x: int, m: int) -> int:
    return ((x + m - 1) // m) * m


def _mlp_kernel(x_ref, *refs, num_layers: int):
    """Fused MLP forward on one batch tile.

    Ref order: x_ref, (w0, b0, w1, b1, ...), o_ref.
    Weights are (in, out) (pre-transposed); biases are (1, out) in f32.
    Any input normalization has already been folded into layer 0.
    """
    layer_refs = refs[: 2 * num_layers]
    o_ref = refs[2 * num_layers]

    h = x_ref[...]
    for i in range(num_layers):
        w = layer_refs[2 * i][...]                              # (in, out)
        b = layer_refs[2 * i + 1][...]                          # (1, out) f32
        if h.dtype != w.dtype:
            h = h.astype(w.dtype)                               # one cast/layer
        h = jnp.dot(h, w, preferred_element_type=jnp.float32) + b
        if i < num_layers - 1:                                  # ReLU on all but last
            h = jnp.maximum(h, 0.0)
    o_ref[...] = h.astype(o_ref.dtype)


class NNHiddenPallas:
    """JAX/Pallas mirror of NN_Hidden(l) with a single fused forward kernel."""

    MAX_BATCH_TILE = 2048    # rows per grid step (upper bound)
    MIN_SPLIT_BATCH = 512    # below this: one tile; at/above: >=2 even tiles (v7x)

    def __init__(self, l, key, weight_dtype=jnp.bfloat16):
        self.l = list(l)
        self.num_layers = len(self.l) - 1
        assert self.num_layers >= 1
        self.weight_dtype = jnp.dtype(weight_dtype)

        self.weights = []    # master f32 (in, out) arrays (already W.T)
        self.biases = []     # master f32 (1, out) arrays
        for i in range(self.num_layers):
            fan_in, fan_out = self.l[i], self.l[i + 1]
            key, kw, kb = jax.random.split(key, 3)
            bound = float(fan_in) ** -0.5
            # PyTorch Linear stores W as (out, in); we keep it as (in, out).
            w_t = jax.random.uniform(kw, (fan_in, fan_out), jnp.float32,
                                     minval=-bound, maxval=bound)
            b = jax.random.uniform(kb, (1, fan_out), jnp.float32,
                                   minval=-bound, maxval=bound)
            self.weights.append(w_t)
            self.biases.append(b)

        self.norm_in = False
        self.mean = None
        self.range = None
        self._weight_pm = _UNRESOLVED
        self._build_effective()

    # ------------------------------------------------------------------ #
    def set_norm(self, mean, rng):
        self.norm_in = True
        self.mean = jnp.asarray(mean, jnp.float32).reshape(1, -1)
        self.range = jnp.asarray(rng, jnp.float32).reshape(1, -1)
        self._build_effective()

    def _build_effective(self):
        """Fold normalization into layer 0; lane-pad hidden widths to 128."""
        ws = list(self.weights)
        bs = list(self.biases)
        if self.norm_in:
            inv_r = 1.0 / self.range                               # (1, d_in)
            ws[0] = ws[0] * inv_r.reshape(-1, 1)                   # row scale
            bs[0] = bs[0] - (self.mean * inv_r) @ self.weights[0]  # (1, d_h0)

        # Zero-pad every *hidden* width up to a multiple of 128 so the
        # bias-add/ReLU VPU passes and the MXU K/N dims are lane-dense. Both
        # the producing layer's extra output cols/bias entries and the
        # consuming layer's extra input rows are zero, so padded lanes stay
        # exactly zero through ReLU and the result is unchanged. The input
        # width (set by x) and the final output width (HBM writeback) are NOT
        # padded.
        widths = list(self.l)
        padded = ([widths[0]]
                  + [_round_up(w, 128) for w in widths[1:-1]]
                  + [widths[-1]])

        eff_w, eff_b = [], []
        for i in range(self.num_layers):
            w, b = ws[i], bs[i]
            pad_in = padded[i] - w.shape[0]
            pad_out = padded[i + 1] - w.shape[1]
            if pad_in or pad_out:
                w = jnp.pad(w, ((0, pad_in), (0, pad_out)))
            if pad_out:
                b = jnp.pad(b, ((0, 0), (0, pad_out)))
            wdt = self.weight_dtype
            if (i == 0 and self.norm_in
                    and self.weight_dtype != jnp.dtype(jnp.float32)):
                # Keep layer 0 in f32 so the folded 1/Range scale is not
                # rounded into bf16 weights (it's a tiny layer anyway).
                wdt = jnp.dtype(jnp.float32)
            eff_w.append(w.astype(wdt))
            eff_b.append(b.astype(jnp.float32))

        self._eff_w = eff_w
        self._eff_b = eff_b
        self._padded_widths = padded

    # ------------------------------------------------------------------ #
    def _choose_tiling(self, batch):
        if batch >= self.MIN_SPLIT_BATCH:
            # >= 2 tiles with an even count: the "parallel" batch axis is
            # sharded across v7x's two TensorCores, so a length-1 or odd grid
            # leaves a core idle or 2:1 imbalanced.
            grid = max(2, -(-batch // self.MAX_BATCH_TILE))
            if grid % 2:
                grid += 1
            tb = _round_up(-(-batch // grid), 8)
        else:
            grid = 1
            tb = _round_up(max(batch, 1), 8)
        return tb, grid, tb * grid

    # ------------------------------------------------------------------ #
    def _run(self, x, tb, grid, weight_pm):
        batch_pad, d_in = x.shape
        d_out = self._eff_w[-1].shape[1]
        out_dtype = x.dtype

        kernel = functools.partial(_mlp_kernel, num_layers=self.num_layers)

        operands = [x]
        in_specs = [pl.BlockSpec((tb, d_in), lambda i: (i, 0))]
        for w, b in zip(self._eff_w, self._eff_b):
            operands += [w, b]
            # Constant index maps keep weights/biases VMEM-resident across all
            # batch tiles (no re-DMA per grid step). Single-buffer them when
            # supported: the block index never changes, so the second buffer
            # is pure VMEM waste.
            if weight_pm is not None:
                in_specs += [
                    pl.BlockSpec(w.shape, lambda i: (0, 0),
                                 pipeline_mode=weight_pm),
                    pl.BlockSpec(b.shape, lambda i: (0, 0),
                                 pipeline_mode=weight_pm),
                ]
            else:
                in_specs += [pl.BlockSpec(w.shape, lambda i: (0, 0)),
                             pl.BlockSpec(b.shape, lambda i: (0, 0))]

        param_bytes = sum(int(a.size) * a.dtype.itemsize for a in operands[1:])
        flops = 2 * batch_pad * sum(int(w.shape[0]) * int(w.shape[1])
                                    for w in self._eff_w)
        bytes_accessed = (int(x.size) * x.dtype.itemsize
                          + param_bytes
                          + batch_pad * d_out * jnp.dtype(out_dtype).itemsize)

        # VMEM-residency guard (conservative: assumes 2x-buffered weights).
        max_w = max(self._padded_widths)
        vmem_est = (2 * param_bytes
                    + 2 * tb * d_in * x.dtype.itemsize           # x tile x2
                    + 2 * tb * d_out * jnp.dtype(out_dtype).itemsize  # out x2
                    + 2 * tb * max_w * 4)                        # live f32 acts
        vmem_limit = None
        if vmem_est > (24 << 20):
            # Raise the scoped limit explicitly; cap at v7x's 64 MiB physical.
            vmem_limit = min(int(vmem_est * 3 // 2), 64 << 20)
            # TODO(synk): if vmem_est itself approaches 64 MiB, additionally
            # tile the widest layer's K/N inside the kernel.

        return pl.pallas_call(
            kernel,
            out_shape=jax.ShapeDtypeStruct((batch_pad, d_out), out_dtype),
            grid=(grid,),
            in_specs=in_specs,
            out_specs=pl.BlockSpec((tb, d_out), lambda i: (i, 0)),
            compiler_params=pltpu.CompilerParams(
                dimension_semantics=("parallel",),
                vmem_limit_bytes=vmem_limit),
            cost_estimate=pl.CostEstimate(
                flops=flops, transcendentals=0,
                bytes_accessed=bytes_accessed),
        )(*operands)

    def _resolve_and_run(self, x, tb, grid):
        """First call: try single-buffered weight specs, fall back if needed."""
        options = []
        try:
            options.append(pl.Buffered(1))
        except Exception:       # pl.Buffered missing / rejects buffer_count=1
            pass
        options.append(None)
        last_err = None
        for pm in options:
            try:
                out = jax.block_until_ready(self._run(x, tb, grid, pm))
                self._weight_pm = pm
                return out
            except Exception as e:   # fall back to default double-buffering
                last_err = e
        raise last_err

    # ------------------------------------------------------------------ #
    def __call__(self, x):
        batch, d_in = x.shape
        assert d_in == self.l[0]

        tb, grid, batch_pad = self._choose_tiling(batch)
        if batch_pad != batch:
            # Padded rows compute ReLU(bias)-style garbage and are sliced off;
            # numerically harmless, wasted work scales with the pad amount.
            x = jnp.pad(x, ((0, batch_pad - batch), (0, 0)))

        if self._weight_pm is _UNRESOLVED:
            out = self._resolve_and_run(x, tb, grid)
        else:
            out = self._run(x, tb, grid, self._weight_pm)

        return out[:batch] if batch_pad != batch else out

    # ------------------------------------------------------------------ #
    # Pure-JAX reference with ORIGINAL (unfolded, unpadded, f32) weights and
    # explicit normalization — i.e. the exact PyTorch forward semantics.
    def reference(self, x):
        h = x.astype(jnp.float32)
        if self.norm_in:
            h = (h - self.mean) / self.range
        for i, (w, b) in enumerate(zip(self.weights, self.biases)):
            h = h @ w + b
            if i < self.num_layers - 1:
                h = jnp.maximum(h, 0.0)
        return h


if __name__ == "__main__":
    key = jax.random.PRNGKey(0)
    k_param, k_x, k_mean, k_range, k_big = jax.random.split(key, 5)

    # Layer spec l = [32, 64, 48, 16] -> Linear+ReLU, Linear+ReLU, Linear.
    l = [32, 64, 48, 16]
    mean = jax.random.normal(k_mean, (l[0],), jnp.float32)
    rng = jax.random.uniform(k_range, (l[0],), jnp.float32,
                             minval=0.5, maxval=2.0)

    # 1) f32 weights, no normalization — tight check vs the pure-JAX reference.
    model_f32 = NNHiddenPallas(l, k_param, weight_dtype=jnp.float32)
    x = jax.random.normal(k_x, (8, l[0]), jnp.float32)
    z = jax.block_until_ready(model_f32(x))
    assert z.shape == (8, l[-1])
    assert jnp.allclose(z, model_f32.reference(x), atol=1e-4, rtol=1e-4), \
        "mismatch (plain f32)"

    # 2) Input normalization folded into layer 0.
    model_f32.set_norm(mean, rng)
    z = jax.block_until_ready(model_f32(x))
    assert jnp.allclose(z, model_f32.reference(x), atol=1e-4, rtol=1e-4), \
        "mismatch (norm fold)"

    # 3) Larger batch -> 2-tile even grid (both v7x TCs busy) + batch padding.
    xb = jax.random.normal(k_big, (1030, l[0]), jnp.float32)
    zb = jax.block_until_ready(model_f32(xb))
    assert zb.shape == (1030, l[-1])
    assert jnp.allclose(zb, model_f32.reference(xb), atol=1e-4, rtol=1e-4), \
        "mismatch (tiled)"

    # 4) Default model: bf16 weights with f32 accumulation; layer 0 stays f32
    #    because the normalization scale is folded in.
    model = NNHiddenPallas(l, k_param)
    model.set_norm(mean, rng)
    z16 = jax.block_until_ready(model(x))
    assert jnp.allclose(z16, model.reference(x), atol=5e-2, rtol=5e-2), \
        "mismatch (bf16 weights)"

    # 5) bf16 activations end-to-end (halves x/out HBM bytes, helps v5e most).
    xb16 = x.astype(jnp.bfloat16)
    zb16 = jax.block_until_ready(model(xb16))
    assert zb16.dtype == jnp.bfloat16
    assert jnp.allclose(zb16.astype(jnp.float32), model.reference(x),
                        atol=1e-1, rtol=1e-1), "mismatch (bf16 io)"

    print("KERNEL_OK")
</pallas_src>

<mosaic_0001>
module attributes {stable_mosaic.version = 11 : i64} {
  func.func @_mlp_kernel(%arg0: i32, %arg1: memref<8x32xf32, #tpu.memory_space<vmem>>, %arg2: memref<32x128xf32, #tpu.memory_space<vmem>>, %arg3: memref<1x128xf32, #tpu.memory_space<vmem>>, %arg4: memref<128x128xf32, #tpu.memory_space<vmem>>, %arg5: memref<1x128xf32, #tpu.memory_space<vmem>>, %arg6: memref<128x16xf32, #tpu.memory_space<vmem>>, %arg7: memref<1x16xf32, #tpu.memory_space<vmem>>, %arg8: memref<8x16xf32, #tpu.memory_space<vmem>>) attributes {dimension_semantics = [#tpu.dimension_semantics<parallel>], iteration_bounds = array<i64: 1>, scalar_prefetch = 0 : i64, scratch_operands = 0 : i64, tpu.core_type = #tpu.core_type<tc>, window_params = [{transform_indices = @transform_0, window_bounds = array<i64: 8, 32>}, {pipeline_mode = #tpu.pipeline_mode<synchronous>, transform_indices = @transform_1, window_bounds = array<i64: 32, 128>}, {pipeline_mode = #tpu.pipeline_mode<synchronous>, transform_indices = @transform_2, window_bounds = array<i64: 1, 128>}, {pipeline_mode = #tpu.pipeline_mode<synchronous>, transform_indices = @transform_3, window_bounds = array<i64: 128, 128>}, {pipeline_mode = #tpu.pipeline_mode<synchronous>, transform_indices = @transform_4, window_bounds = array<i64: 1, 128>}, {pipeline_mode = #tpu.pipeline_mode<synchronous>, transform_indices = @transform_5, window_bounds = array<i64: 128, 16>}, {pipeline_mode = #tpu.pipeline_mode<synchronous>, transform_indices = @transform_6, window_bounds = array<i64: 1, 16>}, {transform_indices = @transform_7, window_bounds = array<i64: 8, 16>}]} {
    %c0 = arith.constant 0 : index
    %c0_0 = arith.constant 0 : index
    %0 = vector.load %arg1[%c0, %c0_0] : memref<8x32xf32, #tpu.memory_space<vmem>>, vector<8x32xf32>
    %c0_1 = arith.constant 0 : index
    %c0_2 = arith.constant 0 : index
    %1 = vector.load %arg2[%c0_1, %c0_2] : memref<32x128xf32, #tpu.memory_space<vmem>>, vector<32x128xf32>
    %c0_3 = arith.constant 0 : index
    %c0_4 = arith.constant 0 : index
    %2 = vector.load %arg3[%c0_3, %c0_4] : memref<1x128xf32, #tpu.memory_space<vmem>>, vector<1x128xf32>
    %cst = arith.constant dense<0.000000e+00> : vector<8x128xf32>
    %3 = tpu.matmul %0, %1, %cst {dimension_numbers = #tpu.dot_dimension_numbers<[1], [0], [0], [1], [0, 0, 1, 1], [], []>} : vector<8x32xf32>, vector<32x128xf32>, vector<8x128xf32> -> vector<8x128xf32>
    %4 = vector.broadcast %2 : vector<1x128xf32> to vector<8x128xf32>
    %5 = arith.addf %3, %4 : vector<8x128xf32>
    %cst_5 = arith.constant 0.000000e+00 : f32
    %6 = vector.broadcast %cst_5 : f32 to vector<8x128xf32>
    %7 = arith.maximumf %5, %6 : vector<8x128xf32>
    %c0_6 = arith.constant 0 : index
    %c0_7 = arith.constant 0 : index
    %8 = vector.load %arg4[%c0_6, %c0_7] : memref<128x128xf32, #tpu.memory_space<vmem>>, vector<128x128xf32>
    %c0_8 = arith.constant 0 : index
    %c0_9 = arith.constant 0 : index
    %9 = vector.load %arg5[%c0_8, %c0_9] : memref<1x128xf32, #tpu.memory_space<vmem>>, vector<1x128xf32>
    %cst_10 = arith.constant dense<0.000000e+00> : vector<8x128xf32>
    %10 = tpu.matmul %7, %8, %cst_10 {dimension_numbers = #tpu.dot_dimension_numbers<[1], [0], [0], [1], [0, 0, 1, 1], [], []>} : vector<8x128xf32>, vector<128x128xf32>, vector<8x128xf32> -> vector<8x128xf32>
    %11 = vector.broadcast %9 : vector<1x128xf32> to vector<8x128xf32>
    %12 = arith.addf %10, %11 : vector<8x128xf32>
    %cst_11 = arith.constant 0.000000e+00 : f32
    %13 = vector.broadcast %cst_11 : f32 to vector<8x128xf32>
    %14 = arith.maximumf %12, %13 : vector<8x128xf32>
    %c0_12 = arith.constant 0 : index
    %c0_13 = arith.constant 0 : index
    %15 = vector.load %arg6[%c0_12, %c0_13] : memref<128x16xf32, #tpu.memory_space<vmem>>, vector<128x16xf32>
    %c0_14 = arith.constant 0 : index
    %c0_15 = arith.constant 0 : index
    %16 = vector.load %arg7[%c0_14, %c0_15] : memref<1x16xf32, #tpu.memory_space<vmem>>, vector<1x16xf32>
    %cst_16 = arith.constant dense<0.000000e+00> : vector<8x16xf32>
    %17 = tpu.matmul %14, %15, %cst_16 {dimension_numbers = #tpu.dot_dimension_numbers<[1], [0], [0], [1], [0, 0, 1, 1], [], []>} : vector<8x128xf32>, vector<128x16xf32>, vector<8x16xf32> -> vector<8x16xf32>
    %18 = vector.broadcast %16 : vector<1x16xf32> to vector<8x16xf32>
    %19 = arith.addf %17, %18 : vector<8x16xf32>
    %c0_17 = arith.constant 0 : index
    %c0_18 = arith.constant 0 : index
    %20 = vector.load %arg8[%c0_17, %c0_18] : memref<8x16xf32, #tpu.memory_space<vmem>>, vector<8x16xf32>
    tpu.vector_store %arg8[%c0_17, %c0_18], %19 {strides = array<i32>} : memref<8x16xf32, #tpu.memory_space<vmem>>, vector<8x16xf32>,
    return
  }
  func.func @transform_0(%arg0: i32) -> (i32, i32) {
    %c0_i32 = arith.constant 0 : i32
    %c0_i32_0 = arith.constant 0 : i32
    return %arg0, %c0_i32 : i32, i32
  }
  func.func @transform_1(%arg0: i32) -> (i32, i32) {
    %c0_i32 = arith.constant 0 : i32
    %c0_i32_0 = arith.constant 0 : i32
    %c0_i32_1 = arith.constant 0 : i32
    return %c0_i32, %c0_i32_0 : i32, i32
  }
  func.func @transform_2(%arg0: i32) -> (i32, i32) {
    %c0_i32 = arith.constant 0 : i32
    %c0_i32_0 = arith.constant 0 : i32
    %c0_i32_1 = arith.constant 0 : i32
    return %c0_i32, %c0_i32_0 : i32, i32
  }
  func.func @transform_3(%arg0: i32) -> (i32, i32) {
    %c0_i32 = arith.constant 0 : i32
    %c0_i32_0 = arith.constant 0 : i32
    %c0_i32_1 = arith.constant 0 : i32
    return %c0_i32, %c0_i32_0 : i32, i32
  }
  func.func @transform_4(%arg0: i32) -> (i32, i32) {
    %c0_i32 = arith.constant 0 : i32
    %c0_i32_0 = arith.constant 0 : i32
    %c0_i32_1 = arith.constant 0 : i32
    return %c0_i32, %c0_i32_0 : i32, i32
  }
  func.func @transform_5(%arg0: i32) -> (i32, i32) {
    %c0_i32 = arith.constant 0 : i32
    %c0_i32_0 = arith.constant 0 : i32
    %c0_i32_1 = arith.constant 0 : i32
    return %c0_i32, %c0_i32_0 : i32, i32
  }
  func.func @transform_6(%arg0: i32) -> (i32, i32) {
    %c0_i32 = arith.constant 0 : i32
    %c0_i32_0 = arith.constant 0 : i32
    %c0_i32_1 = arith.constant 0 : i32
    return %c0_i32, %c0_i32_0 : i32, i32
  }
  func.func @transform_7(%arg0: i32) -> (i32, i32) {
    %c0_i32 = arith.constant 0 : i32
    %c0_i32_0 = arith.constant 0 : i32
    return %arg0, %c0_i32 : i32, i32
  }
}

module attributes {stable_mosaic.version = 11 : i64} {
  func.func @_mlp_kernel(%arg0: i32, %arg1: memref<8x32xf32, #tpu.memory_space<vmem>>, %arg2: memref<32x128xf32, #tpu.memory_space<vmem>>, %arg3: memref<1x128xf32, #tpu.memory_space<vmem>>, %arg4: memref<128x128xf32, #tpu.memory_space<vmem>>, %arg5: memref<1x128xf32, #tpu.memory_space<vmem>>, %arg6: memref<128x16xf32, #tpu.memory_space<vmem>>, %arg7: memref<1x16xf32, #tpu.memory_space<vmem>>, %arg8: memref<8x16xf32, #tpu.memory_space<vmem>>) attributes {dimension_semantics = [#tpu.dimension_semantics<parallel>], iteration_bounds = array<i64: 1>, scalar_prefetch = 0 : i64, scratch_operands = 0 : i64, tpu.core_type = #tpu.core_type<tc>, window_params = [{transform_indices = @transform_0, window_bounds = array<i64: 8, 32>}, {pipeline_mode = #tpu.pipeline_mode<synchronous>, transform_indices = @transform_1, window_bounds = array<i64: 32, 128>}, {pipeline_mode = #tpu.pipeline_mode<synchronous>, transform_indices = @transform_2, window_bounds = array<i64: 1, 128>}, {pipeline_mode = #tpu.pipeline_mode<synchronous>, transform_indices = @transform_3, window_bounds = array<i64: 128, 128>}, {pipeline_mode = #tpu.pipeline_mode<synchronous>, transform_indices = @transform_4, window_bounds = array<i64: 1, 128>}, {pipeline_mode = #tpu.pipeline_mode<synchronous>, transform_indices = @transform_5, window_bounds = array<i64: 128, 16>}, {pipeline_mode = #tpu.pipeline_mode<synchronous>, transform_indices = @transform_6, window_bounds = array<i64: 1, 16>}, {transform_indices = @transform_7, window_bounds = array<i64: 8, 16>}]} {
    %c0 = arith.constant 0 : index
    %c0_0 = arith.constant 0 : index
    %0 = vector.load %arg1[%c0, %c0_0] : memref<8x32xf32, #tpu.memory_space<vmem>>, vector<8x32xf32>
    %c0_1 = arith.constant 0 : index
    %c0_2 = arith.constant 0 : index
    %1 = vector.load %arg2[%c0_1, %c0_2] : memref<32x128xf32, #tpu.memory_space<vmem>>, vector<32x128xf32>
    %c0_3 = arith.constant 0 : index
    %c0_4 = arith.constant 0 : index
    %2 = vector.load %arg3[%c0_3, %c0_4] : memref<1x128xf32, #tpu.memory_space<vmem>>, vector<1x128xf32>
    %cst = arith.constant dense<0.000000e+00> : vector<8x128xf32>
    %3 = tpu.matmul %0, %1, %cst {dimension_numbers = #tpu.dot_dimension_numbers<[1], [0], [0], [1], [0, 0, 1, 1], [], []>} : vector<8x32xf32>, vector<32x128xf32>, vector<8x128xf32> -> vector<8x128xf32>
    %4 = vector.broadcast %2 : vector<1x128xf32> to vector<8x128xf32>
    %5 = arith.addf %3, %4 : vector<8x128xf32>
    %cst_5 = arith.constant 0.000000e+00 : f32
    %6 = vector.broadcast %cst_5 : f32 to vector<8x128xf32>
    %7 = arith.maximumf %5, %6 : vector<8x128xf32>
    %c0_6 = arith.constant 0 : index
    %c0_7 = arith.constant 0 : index
    %8 = vector.load %arg4[%c0_6, %c0_7] : memref<128x128xf32, #tpu.memory_space<vmem>>, vector<128x128xf32>
    %c0_8 = arith.constant 0 : index
    %c0_9 = arith.constant 0 : index
    %9 = vector.load %arg5[%c0_8, %c0_9] : memref<1x128xf32, #tpu.memory_space<vmem>>, vector<1x128xf32>
    %cst_10 = arith.constant dense<0.000000e+00> : vector<8x128xf32>
    %10 = tpu.matmul %7, %8, %cst_10 {dimension_numbers = #tpu.dot_dimension_numbers<[1], [0], [0], [1], [0, 0, 1, 1], [], []>} : vector<8x128xf32>, vector<128x128xf32>, vector<8x128xf32> -> vector<8x128xf32>
    %11 = vector.broadcast %9 : vector<1x128xf32> to vector<8x128xf32>
    %12 = arith.addf %10, %11 : vector<8x128xf32>
    %cst_11 = arith.constant 0.000000e+00 : f32
    %13 = vector.broadcast %cst_11 : f32 to vector<8x128xf32>
    %14 = arith.maximumf %12, %13 : vector<8x128xf32>
    %c0_12 = arith.constant 0 : index
    %c0_13 = arith.constant 0 : index
    %15 = vector.load %arg6[%c0_12, %c0_13] : memref<128x16xf32, #tpu.memory_space<vmem>>, vector<128x16xf32>
    %c0_14 = arith.constant 0 : index
    %c0_15 = arith.constant 0 : index
    %16 = vector.load %arg7[%c0_14, %c0_15] : memref<1x16xf32, #tpu.memory_space<vmem>>, vector<1x16xf32>
    %cst_16 = arith.constant dense<0.000000e+00> : vector<8x16xf32>
    %17 = tpu.matmul %14, %15, %cst_16 {dimension_numbers = #tpu.dot_dimension_numbers<[1], [0], [0], [1], [0, 0, 1, 1], [], []>} : vector<8x128xf32>, vector<128x16xf32>, vector<8x16xf32> -> vector<8x16xf32>
    %18 = vector.broadcast %16 : vector<1x16xf32> to vector<8x16xf32>
    %19 = arith.addf %17, %18 : vector<8x16xf32>
    %c0_17 = arith.constant 0 : index
    %c0_18 = arith.constant 0 : index
    %20 = vector.load %arg8[%c0_17, %c0_18] : memref<8x16xf32, #tpu.memory_space<vmem>>, vector<8x16xf32>
    tpu.vector_store %arg8[%c0_17, %c0_18], %19 {strides = array<i32>} : memref<8x16xf32, #tpu.memory_space<vmem>>, vector<8x16xf32>,
    return
  }
  func.func @transform_0(%arg0: i32) -> (i32, i32) {
    %c0_i32 = arith.constant 0 : i32
    %c0_i32_0 = arith.constant 0 : i32
    return %arg0, %c0_i32 : i32, i32
  }
  func.func @transform_1(%arg0: i32) -> (i32, i32) {
    %c0_i32 = arith.constant 0 : i32
    %c0_i32_0 = arith.constant 0 : i32
    %c0_i32_1 = arith.constant 0 : i32
    return %c0_i32, %c0_i32_0 : i32, i32
  }
  func.func @transform_2(%arg0: i32) -> (i32, i32) {
    %c0_i32 = arith.constant 0 : i32
    %c0_i32_0 = arith.constant 0 : i32
    %c0_i32_1 = arith.constant 0 : i32
    return %c0_i32, %c0_i32_0 : i32, i32
  }
  func.func @transform_3(%arg0: i32) -> (i32, i32) {
    %c0_i32 = arith.constant 0 : i32
    %c0_i32_0 = arith.constant 0 : i32
    %c0_i32_1 = arith.constant 0 : i32
    return %c0_i32, %c0_i32_0 : i32, i32
  }
  func.func @transform_4(%arg0: i32) -> (i32, i32) {
    %c0_i32 = arith.constant 0 : i32
    %c0_i32_0 = arith.constant 0 : i32
    %c0_i32_1 = arith.constant 0 : i32
    return %c0_i32, %c0_i32_0 : i32, i32
  }
  func.func @transform_5(%arg0: i32) -> (i32, i32) {
    %c0_i32 = arith.constant 0 : i32
    %c0_i32_0 = arith.constant 0 : i32
    %c0_i32_1 = arith.constant 0 : i32
    return %c0_i32, %c0_i32_0 : i32, i32
  }
  func.func @transform_6(%arg0: i32) -> (i32, i32) {
    %c0_i32 = arith.constant 0 : i32
    %c0_i32_0 = arith.constant 0 : i32
    %c0_i32_1 = arith.constant 0 : i32
    return %c0_i32, %c0_i32_0 : i32, i32
  }
  func.func @transform_7(%arg0: i32) -> (i32, i32) {
    %c0_i32 = arith.constant 0 : i32
    %c0_i32_0 = arith.constant 0 : i32
    return %arg0, %c0_i32 : i32, i32
  }
}

</mosaic_0001>

<bundles_post_ra>
// kernel: tpu_custom_call.1
= control target key start
LH: loop header
LB: loop body
LE: loop exit
PB: predicated region body
PF: predicated region fallthrough
CT: control target
= control target key end

     0   :  { %12 = vsyncpa [#allocation3], 0  ;;  %s765_s0 = inlined_call_operand.vmem [shape: f32[8,32], index: 0, kind: input, shape index: {}]   ;;  %s766_s1 = inlined_call_operand.hbm [shape: f32[32,128], index: 1, kind: input, shape index: {}]   ;;  %s767_s2 = inlined_call_operand.vmem [shape: f32[1,128], index: 2, kind: input, shape index: {}]   ;;  %s768_s3 = inlined_call_operand.vmem [shape: f32[128,128], index: 3, kind: input, shape index: {}]   ;;  %s769_s4 = inlined_call_operand.vmem [shape: f32[1,128], index: 4, kind: input, shape index: {}]   ;;  %s770_s5 = inlined_call_operand.vmem [shape: f32[128,16], index: 5, kind: input, shape index: {}]   ;;  %s771_s6 = inlined_call_operand.vmem [shape: f32[1,16], index: 6, kind: input, shape index: {}]   ;;  %s772_s7 = inlined_call_operand.hbm [shape: f32[8,16], index: 7, kind: output, shape index: {}]  }
   0x1   :  { %13 = vsyncpa [#allocation4], 0  ;;  %s565_s24 = smov [#allocation2]   ;;  %s517_s28 = scalar_lea.hbm %s766_s1, 512 }
   0x2   :  { %s21_s25 = sshll.u32 %s565_s24, 4  ;;  %p518_p0 = scmp.ne.s32.totalorder %s766_s1, %s517_s28  ;;  %s22_s25 = int_to_ptr.vmem [resolvable:$true] %s21_s25 }
   0x3   :  { %p521_p1 = scmp.lt.u32.totalorder %s517_s28, %s766_s1 }
   0x5   :  { %p523_p2 = pnand %p521_p1, %p518_p0 }
   0x7   :  { %526 = shalt.err (!%p523_p2)
}
   0x8   :  { %s527_s10 = scalar_lea.vmem %s22_s25, 512  ;;  %p532_p4 = scmp.lt.s32.totalorder %s22_s25, %s22_s25 }
   0x9   :  { %p528_p3 = scmp.ne.s32.totalorder %s22_s25, %s527_s10  ;;  %p533_p5 = scmp.lt.s32.totalorder %s527_s10, %s527_s10 }
   0xb   :  { %p534_p6 = por %p533_p5, %p532_p4 }
   0xd   :  { %p535_p7 = pnand %p534_p6, %p528_p3 }
   0xf   :  { %538 = shalt.err (!%p535_p7)
}
  0x10   :  { %s566_s11 = smov 128   ;;  %s567_s12 = smov 8  }
  0x11   :  { %27 = dma.hbm_to_vmem [thread:$0]  %s766_s1, 512, %s22_s25, [#allocation3], %s566_s11, %s566_s11, %s567_s12  }
  0x12   :  { %561 = dma.done.wait [#allocation3], 512  }
  0x13   :  { %562 = vsyncadd [#allocation3], 4294966784  ;;  %v568_v0 = vmov 0.0|0.0   ;;  %vm569_vm0 = vmmov 0   ;;  %v570_v1 = vmov 0.0   ;;  %v42_v2 = vld [vmem:[#allocation2] sm:$0xff] }
  0x14   :  { %456 = vmatprep.subr.bf16.mxu0 %v568_v0  ;;  %383 = vmatprep.mubr.msk.f32.mxu0 %vm569_vm0, %v570_v1  ;;  %v43_v3 = vld [vmem:[#allocation2 + $0x8] sm:$0xff]  ;;  %v44_v4 = vld [vmem:[#allocation2 + $0x10] sm:$0xff]  ;;  %v45_v6 = vld [vmem:[#allocation2 + $0x18] sm:$0xff]  ;;  %vm53_vm1 = vcmask 261120   ;;  %s571_s9 = smov [#allocation5]   ;;  %vm315_vm2 = vcmask 130048  }
  0x15   :  { %462 = vmatprep.subr.bf16.mxu1 %v568_v0  ;;  %418 = vmatprep.mubr.msk.f32.mxu1 %vm569_vm0, %v570_v1  ;;  %v457_v5 = vpack.c.bf16 %v43_v3, %v42_v2  ;;  %v128_v7 = vld [vmem:[%s768_s3] sm:$0xff]  ;;  %v129_v8 = vld [vmem:[%s768_s3 + $0x8] sm:$0xff]  ;;  %v130_v9 = vld [vmem:[%s768_s3 + $0x10] sm:$0xff]  ;;  %v460_v11 = vpack.c.bf16 %v45_v6, %v44_v4  ;;  %s323_s10 = sshll.u32 %s571_s9, 4  ;;  %s324_s10 = int_to_ptr.vmem [resolvable:$true] %s323_s10 }
  0x16   :  { %v131_v10 = vld [vmem:[%s768_s3 + $0x18] sm:$0xff]  ;;  %v463_v12 = vpack.c.bf16 %v129_v8, %v128_v7  ;;  %v132_v14 = vld [vmem:[%s768_s3 + $0x20] sm:$0xff]  ;;  %v133_v15 = vld [vmem:[%s768_s3 + $0x28] sm:$0xff]  ;;  %p544_p9 = scmp.lt.s32.totalorder %s324_s10, %s324_s10 }
  0x17   :  { %458 = vmatpush3.bf16.msra.mxu0 %v457_v5  ;;  %v466_v13 = vpack.c.bf16 %v131_v10, %v130_v9  ;;  %v41_v16 = vld [vmem:[%s765_s0] sm:$0xff]  ;;  %v469_v17 = vpack.c.bf16 %v133_v15, %v132_v14  ;;  %v134_v18 = vld [vmem:[%s768_s3 + $0x30] sm:$0xff]  ;;  %v135_v19 = vld [vmem:[%s768_s3 + $0x38] sm:$0xff] }
  0x18   :  { %459 = vmatprep.subr.bf16.mxu0 %v568_v0  ;;  %464 = vmatpush3.bf16.msra.mxu1 %v463_v12  ;;  %v472_v20 = vpack.c.bf16 %v135_v19, %v134_v18  ;;  %v136_v21 = vld [vmem:[%s768_s3 + $0x40] sm:$0xff]  ;;  %v137_v22 = vld [vmem:[%s768_s3 + $0x48] sm:$0xff]  ;;  %v138_v24 = vld [vmem:[%s768_s3 + $0x50] sm:$0xff] }
  0x19   :  { %465 = vmatprep.subr.bf16.mxu1 %v568_v0  ;;  %v475_v23 = vpack.c.bf16 %v137_v22, %v136_v21  ;;  %v139_v25 = vld [vmem:[%s768_s3 + $0x58] sm:$0xff]  ;;  %v140_v27 = vld [vmem:[%s768_s3 + $0x60] sm:$0xff]  ;;  %v141_v28 = vld [vmem:[%s768_s3 + $0x68] sm:$0xff] }
  0x1a   :  { %v478_v26 = vpack.c.bf16 %v139_v25, %v138_v24  ;;  %v481_v29 = vpack.c.bf16 %v141_v28, %v140_v27  ;;  %v142_v30 = vld [vmem:[%s768_s3 + $0x70] sm:$0xff]  ;;  %v143_v31 = vld [vmem:[%s768_s3 + $0x78] sm:$0xff]  ;;  %v222_v33 = vld [vmem:[%s770_s5] sm:$0xff] }
  0x1b   :  { %461 = vmatpush3.bf16.msra.mxu0 %v460_v11  ;;  %v484_v32 = vpack.c.bf16 %v143_v31, %v142_v30  ;;  %v223_v34 = vld [vmem:[%s770_s5 + $0x8] sm:$0xff]  ;;  %v224_v35 = vld [vmem:[%s770_s5 + $0x10] sm:$0xff]  ;;  %v225_v37 = vld [vmem:[%s770_s5 + $0x18] sm:$0xff] }
  0x1c   :  { %486 = vmatprep.subr.bf16.mxu0 %v568_v0  ;;  %467 = vmatpush3.bf16.msra.mxu1 %v466_v13  ;;  %v487_v36 = vpack.c.bf16 %v223_v34, %v222_v33  ;;  %v490_v38 = vpack.c.bf16 %v225_v37, %v224_v35  ;;  %v226_v39 = vld [vmem:[%s770_s5 + $0x20] sm:$0xff]  ;;  %v227_v40 = vld [vmem:[%s770_s5 + $0x28] sm:$0xff]  ;;  %v228_v42 = vld [vmem:[%s770_s5 + $0x30] sm:$0xff] }
  0x1d   :  { %468 = vmatprep.subr.bf16.mxu1 %v568_v0  ;;  %v493_v41 = vpack.c.bf16 %v227_v40, %v226_v39  ;;  %v229_v43 = vld [vmem:[%s770_s5 + $0x38] sm:$0xff]  ;;  %v230_v45 = vld [vmem:[%s770_s5 + $0x40] sm:$0xff]  ;;  %v231_v46 = vld [vmem:[%s770_s5 + $0x48] sm:$0xff] }
  0x1e   :  { %384 = vmatmul.mubr.msk.f32.vlgmr.msra.gmra.mrb[0].mxu0 %vm53_vm1, %v41_v16  ;;  %v496_v44 = vpack.c.bf16 %v229_v43, %v228_v42  ;;  %v499_v47 = vpack.c.bf16 %v231_v46, %v230_v45  ;;  %v232_v48 = vld [vmem:[%s770_s5 + $0x50] sm:$0xff]  ;;  %v233_v49 = vld [vmem:[%s770_s5 + $0x58] sm:$0xff]  ;;  %v234_v51 = vld [vmem:[%s770_s5 + $0x60] sm:$0xff] }
  0x1f   :  { %453 = vmatprep.mubr.msk.f32.mxu0 %vm569_vm0, %v570_v1  ;;  %488 = vmatpush3.bf16.msra.mxu0 %v487_v36  ;;  %v502_v50 = vpack.c.bf16 %v233_v49, %v232_v48  ;;  %v235_v52 = vld [vmem:[%s770_s5 + $0x68] sm:$0xff]  ;;  %v332_v54 = vld [vmem:[%s767_s2] ss:$0 sm:$0xff]  ;;  %v236_v59 = vld [vmem:[%s770_s5 + $0x70] sm:$0xff] }
  0x20   :  { %470 = vmatpush3.bf16.msra.mxu1 %v469_v17  ;;  %489 = vmatprep.subr.bf16.mxu0 %v568_v0  ;;  %v505_v53 = vpack.c.bf16 %v235_v52, %v234_v51  ;;  %v237_v60 = vld [vmem:[%s770_s5 + $0x78] sm:$0xff]  ;;  %v334_v62 = vld [vmem:[%s769_s4] ss:$0 sm:$0xff]  ;;  %s539_s5 = scalar_lea.vmem %s324_s10, 128 }
  0x21   :  { %471 = vmatprep.subr.bf16.mxu1 %v568_v0  ;;  %v508_v61 = vpack.c.bf16 %v237_v60, %v236_v59  ;;  %v335_v3 = vld [vmem:[%s771_s6] ss:$0 sm:$0xff]  ;;  %p540_p8 = scmp.ne.s32.totalorder %s324_s10, %s539_s5  ;;  %p545_p10 = scmp.lt.s32.totalorder %s539_s5, %s539_s5 }
  0x23   :  { %491 = vmatpush3.bf16.msra.mxu0 %v490_v38  ;;  %p546_p11 = por %p545_p10, %p544_p9 }
  0x24   :  { %473 = vmatpush3.bf16.msra.mxu1 %v472_v20  ;;  %492 = vmatprep.subr.bf16.mxu0 %v568_v0 }
  0x25   :  { %474 = vmatprep.subr.bf16.mxu1 %v568_v0  ;;  %p547_p12 = pnand %p546_p11, %p540_p8 }
  0x27   :  { %494 = vmatpush3.bf16.msra.mxu0 %v493_v41 }
  0x28   :  { %476 = vmatpush3.bf16.msra.mxu1 %v475_v23  ;;  %495 = vmatprep.subr.bf16.mxu0 %v568_v0 }
  0x29   :  { %477 = vmatprep.subr.bf16.mxu1 %v568_v0 }
  0x2b   :  { %497 = vmatpush3.bf16.msra.mxu0 %v496_v44 }
  0x2c   :  { %479 = vmatpush3.bf16.msra.mxu1 %v478_v26  ;;  %498 = vmatprep.subr.bf16.mxu0 %v568_v0 }
  0x2d   :  { %480 = vmatprep.subr.bf16.mxu1 %v568_v0 }
  0x2f   :  { %500 = vmatpush3.bf16.msra.mxu0 %v499_v47 }
  0x30   :  { %482 = vmatpush3.bf16.msra.mxu1 %v481_v29  ;;  %501 = vmatprep.subr.bf16.mxu0 %v568_v0 }
  0x31   :  { %483 = vmatprep.subr.bf16.mxu1 %v568_v0 }
  0x33   :  { %503 = vmatpush3.bf16.msra.mxu0 %v502_v50 }
  0x34   :  { %485 = vmatpush3.bf16.msra.mxu1 %v484_v32  ;;  %504 = vmatprep.subr.bf16.mxu0 %v568_v0 }
  0x37   :  { %506 = vmatpush3.bf16.msra.mxu0 %v505_v53 }
  0x38   :  { %507 = vmatprep.subr.bf16.mxu0 %v568_v0 }
  0x3b   :  { %509 = vmatpush3.bf16.msra.mxu0 %v508_v61 }
  0xf1   :  { %v123_v55 = vpop.f32.mrb[0].mxu0 }
  0xf2   :  { %v124_v56 = vadd.f32 %v332_v54, %v123_v55  ;;  %v385_v57 = vpop.f32.mrb[1].mxu0 }
  0xf4   :  { %v127_v58 = vmax.f32 %v124_v56, 0.0 }
  0xf6   :  { %419 = vmatmul.mubr.f32.vlgmr.msra.gmra.mrb[0].mxu1 %v127_v58 }
 0x1c9   :  { %v217_v63 = vpop.f32.mrb[0].mxu1 }
 0x1ca   :  { %v218_v0 = vadd.f32 %v334_v62, %v217_v63  ;;  %v420_v1 = vpop.f32.mrb[1].mxu1 }
 0x1cc   :  { %v221_v2 = vmax.f32 %v218_v0, 0.0 }
 0x1ce   :  { %454 = vmatmul.mubr.f32.vlgmr.msra.gmra.mrb[2].mxu0 %v221_v2 }
 0x2a1   :  { %v311_v4 = vpop.f32.mrb[2].mxu0 }
 0x2a2   :  { %v312_v5 = vadd.f32 %v335_v3, %v311_v4  ;;  %v455_v6 = vpop.f32.mrb[3].mxu0 }
 0x2a4   :  { %316 = vst.msk [vmem:[#allocation5] sm:$0xff] %vm315_vm2, %v312_v5 }
 0x2a5   :  { %550 = shalt.err (!%p547_p12)
}
 0x2a6   :  { %s551_s12 = scalar_lea.hbm %s772_s7, 128 }
 0x2a7   :  { %p552_p13 = scmp.ne.s32.totalorder %s772_s7, %s551_s12  ;;  %p555_p0 = scmp.lt.u32.totalorder %s551_s12, %s772_s7 }
 0x2a9   :  { %p557_p1 = pnand %p555_p0, %p552_p13 }
 0x2ab   :  { %560 = shalt.err (!%p557_p1)
}
 0x2ac   :  { %326 = dma.vmem_to_hbm [thread:$0]  %s324_s10, 128, %s772_s7, [#allocation4]  }
 0x2ad   :  { %563 = dma.done.wait [#allocation4], 128  }
 0x2ae   :  { %564 = vsyncadd [#allocation4], 4294967168 }
 0x2af   :  { %330 = vsyncpa [#allocation3], 1 }
 0x2b0   :  { %331 = vsyncpa [#allocation4], 1 }

// kernel: tpu_custom_call.1
= control target key start
LH: loop header
LB: loop body
LE: loop exit
PB: predicated region body
PF: predicated region fallthrough
CT: control target
= control target key end

     0   :  { %12 = vsyncpa [#allocation3], 0  ;;  %s765_s0 = inlined_call_operand.vmem [shape: f32[8,32], index: 0, kind: input, shape index: {}]   ;;  %s766_s1 = inlined_call_operand.hbm [shape: f32[32,128], index: 1, kind: input, shape index: {}]   ;;  %s767_s2 = inlined_call_operand.vmem [shape: f32[1,128], index: 2, kind: input, shape index: {}]   ;;  %s768_s3 = inlined_call_operand.vmem [shape: f32[128,128], index: 3, kind: input, shape index: {}]   ;;  %s769_s4 = inlined_call_operand.vmem [shape: f32[1,128], index: 4, kind: input, shape index: {}]   ;;  %s770_s5 = inlined_call_operand.vmem [shape: f32[128,16], index: 5, kind: input, shape index: {}]   ;;  %s771_s6 = inlined_call_operand.vmem [shape: f32[1,16], index: 6, kind: input, shape index: {}]   ;;  %s772_s7 = inlined_call_operand.hbm [shape: f32[8,16], index: 7, kind: output, shape index: {}]  }
   0x1   :  { %13 = vsyncpa [#allocation4], 0  ;;  %s565_s24 = smov [#allocation2]   ;;  %s517_s28 = scalar_lea.hbm %s766_s1, 512 }
   0x2   :  { %s21_s25 = sshll.u32 %s565_s24, 4  ;;  %p518_p0 = scmp.ne.s32.totalorder %s766_s1, %s517_s28  ;;  %s22_s25 = int_to_ptr.vmem [resolvable:$true] %s21_s25 }
   0x3   :  { %p521_p1 = scmp.lt.u32.totalorder %s517_s28, %s766_s1 }
   0x5   :  { %p523_p2 = pnand %p521_p1, %p518_p0 }
   0x7   :  { %526 = shalt.err (!%p523_p2)
}
   0x8   :  { %s527_s10 = scalar_lea.vmem %s22_s25, 512  ;;  %p532_p4 = scmp.lt.s32.totalorder %s22_s25, %s22_s25 }
   0x9   :  { %p528_p3 = scmp.ne.s32.totalorder %s22_s25, %s527_s10  ;;  %p533_p5 = scmp.lt.s32.totalorder %s527_s10, %s527_s10 }
   0xb   :  { %p534_p6 = por %p533_p5, %p532_p4 }
   0xd   :  { %p535_p7 = pnand %p534_p6, %p528_p3 }
   0xf   :  { %538 = shalt.err (!%p535_p7)
}
  0x10   :  { %s566_s11 = smov 128   ;;  %s567_s12 = smov 8  }
  0x11   :  { %27 = dma.hbm_to_vmem [thread:$0]  %s766_s1, 512, %s22_s25, [#allocation3], %s566_s11, %s566_s11, %s567_s12  }
  0x12   :  { %561 = dma.done.wait [#allocation3], 512  }
  0x13   :  { %562 = vsyncadd [#allocation3], 4294966784  ;;  %v568_v0 = vmov 0.0|0.0   ;;  %vm569_vm0 = vmmov 0   ;;  %v570_v1 = vmov 0.0   ;;  %v42_v2 = vld [vmem:[#allocation2] sm:$0xff] }
  0x14   :  { %456 = vmatprep.subr.bf16.mxu0 %v568_v0  ;;  %383 = vmatprep.mubr.msk.f32.mxu0 %vm569_vm0, %v570_v1  ;;  %v43_v3 = vld [vmem:[#allocation2 + $0x8] sm:$0xff]  ;;  %v44_v4 = vld [vmem:[#allocation2 + $0x10] sm:$0xff]  ;;  %v45_v6 = vld [vmem:[#allocation2 + $0x18] sm:$0xff]  ;;  %vm53_vm1 = vcmask 261120   ;;  %s571_s9 = smov [#allocation5]   ;;  %vm315_vm2 = vcmask 130048  }
  0x15   :  { %462 = vmatprep.subr.bf16.mxu1 %v568_v0  ;;  %418 = vmatprep.mubr.msk.f32.mxu1 %vm569_vm0, %v570_v1  ;;  %v457_v5 = vpack.c.bf16 %v43_v3, %v42_v2  ;;  %v128_v7 = vld [vmem:[%s768_s3] sm:$0xff]  ;;  %v129_v8 = vld [vmem:[%s768_s3 + $0x8] sm:$0xff]  ;;  %v130_v9 = vld [vmem:[%s768_s3 + $0x10] sm:$0xff]  ;;  %v460_v11 = vpack.c.bf16 %v45_v6, %v44_v4  ;;  %s323_s10 = sshll.u32 %s571_s9, 4  ;;  %s324_s10 = int_to_ptr.vmem [resolvable:$true] %s323_s10 }
  0x16   :  { %v131_v10 = vld [vmem:[%s768_s3 + $0x18] sm:$0xff]  ;;  %v463_v12 = vpack.c.bf16 %v129_v8, %v128_v7  ;;  %v132_v14 = vld [vmem:[%s768_s3 + $0x20] sm:$0xff]  ;;  %v133_v15 = vld [vmem:[%s768_s3 + $0x28] sm:$0xff]  ;;  %p544_p9 = scmp.lt.s32.totalorder %s324_s10, %s324_s10 }
  0x17   :  { %458 = vmatpush3.bf16.msra.mxu0 %v457_v5  ;;  %v466_v13 = vpack.c.bf16 %v131_v10, %v130_v9  ;;  %v41_v16 = vld [vmem:[%s765_s0] sm:$0xff]  ;;  %v469_v17 = vpack.c.bf16 %v133_v15, %v132_v14  ;;  %v134_v18 = vld [vmem:[%s768_s3 + $0x30] sm:$0xff]  ;;  %v135_v19 = vld [vmem:[%s768_s3 + $0x38] sm:$0xff] }
  0x18   :  { %459 = vmatprep.subr.bf16.mxu0 %v568_v0  ;;  %464 = vmatpush3.bf16.msra.mxu1 %v463_v12  ;;  %v472_v20 = vpack.c.bf16 %v135_v19, %v134_v18  ;;  %v136_v21 = vld [vmem:[%s768_s3 + $0x40] sm:$0xff]  ;;  %v137_v22 = vld [vmem:[%s768_s3 + $0x48] sm:$0xff]  ;;  %v138_v24 = vld [vmem:[%s768_s3 + $0x50] sm:$0xff] }
  0x19   :  { %465 = vmatprep.subr.bf16.mxu1 %v568_v0  ;;  %v475_v23 = vpack.c.bf16 %v137_v22, %v136_v21  ;;  %v139_v25 = vld [vmem:[%s768_s3 + $0x58] sm:$0xff]  ;;  %v140_v27 = vld [vmem:[%s768_s3 + $0x60] sm:$0xff]  ;;  %v141_v28 = vld [vmem:[%s768_s3 + $0x68] sm:$0xff] }
  0x1a   :  { %v478_v26 = vpack.c.bf16 %v139_v25, %v138_v24  ;;  %v481_v29 = vpack.c.bf16 %v141_v28, %v140_v27  ;;  %v142_v30 = vld [vmem:[%s768_s3 + $0x70] sm:$0xff]  ;;  %v143_v31 = vld [vmem:[%s768_s3 + $0x78] sm:$0xff]  ;;  %v222_v33 = vld [vmem:[%s770_s5] sm:$0xff] }
  0x1b   :  { %461 = vmatpush3.bf16.msra.mxu0 %v460_v11  ;;  %v484_v32 = vpack.c.bf16 %v143_v31, %v142_v30  ;;  %v223_v34 = vld [vmem:[%s770_s5 + $0x8] sm:$0xff]  ;;  %v224_v35 = vld [vmem:[%s770_s5 + $0x10] sm:$0xff]  ;;  %v225_v37 = vld [vmem:[%s770_s5 + $0x18] sm:$0xff] }
  0x1c   :  { %486 = vmatprep.subr.bf16.mxu0 %v568_v0  ;;  %467 = vmatpush3.bf16.msra.mxu1 %v466_v13  ;;  %v487_v36 = vpack.c.bf16 %v223_v34, %v222_v33  ;;  %v490_v38 = vpack.c.bf16 %v225_v37, %v224_v35  ;;  %v226_v39 = vld [vmem:[%s770_s5 + $0x20] sm:$0xff]  ;;  %v227_v40 = vld [vmem:[%s770_s5 + $0x28] sm:$0xff]  ;;  %v228_v42 = vld [vmem:[%s770_s5 + $0x30] sm:$0xff] }
  0x1d   :  { %468 = vmatprep.subr.bf16.mxu1 %v568_v0  ;;  %v493_v41 = vpack.c.bf16 %v227_v40, %v226_v39  ;;  %v229_v43 = vld [vmem:[%s770_s5 + $0x38] sm:$0xff]  ;;  %v230_v45 = vld [vmem:[%s770_s5 + $0x40] sm:$0xff]  ;;  %v231_v46 = vld [vmem:[%s770_s5 + $0x48] sm:$0xff] }
  0x1e   :  { %384 = vmatmul.mubr.msk.f32.vlgmr.msra.gmra.mrb[0].mxu0 %vm53_vm1, %v41_v16  ;;  %v496_v44 = vpack.c.bf16 %v229_v43, %v228_v42  ;;  %v499_v47 = vpack.c.bf16 %v231_v46, %v230_v45  ;;  %v232_v48 = vld [vmem:[%s770_s5 + $0x50] sm:$0xff]  ;;  %v233_v49 = vld [vmem:[%s770_s5 + $0x58] sm:$0xff]  ;;  %v234_v51 = vld [vmem:[%s770_s5 + $0x60] sm:$0xff] }
  0x1f   :  { %453 = vmatprep.mubr.msk.f32.mxu0 %vm569_vm0, %v570_v1  ;;  %488 = vmatpush3.bf16.msra.mxu0 %v487_v36  ;;  %v502_v50 = vpack.c.bf16 %v233_v49, %v232_v48  ;;  %v235_v52 = vld [vmem:[%s770_s5 + $0x68] sm:$0xff]  ;;  %v332_v54 = vld [vmem:[%s767_s2] ss:$0 sm:$0xff]  ;;  %v236_v59 = vld [vmem:[%s770_s5 + $0x70] sm:$0xff] }
  0x20   :  { %470 = vmatpush3.bf16.msra.mxu1 %v469_v17  ;;  %489 = vmatprep.subr.bf16.mxu0 %v568_v0  ;;  %v505_v53 = vpack.c.bf16 %v235_v52, %v234_v51  ;;  %v237_v60 = vld [vmem:[%s770_s5 + $0x78] sm:$0xff]  ;;  %v334_v62 = vld [vmem:[%s769_s4] ss:$0 sm:$0xff]  ;;  %s539_s5 = scalar_lea.vmem %s324_s10, 128 }
  0x21   :  { %471 = vmatprep.subr.bf16.mxu1 %v568_v0  ;;  %v508_v61 = vpack.c.bf16 %v237_v60, %v236_v59  ;;  %v335_v3 = vld [vmem:[%s771_s6] ss:$0 sm:$0xff]  ;;  %p540_p8 = scmp.ne.s32.totalorder %s324_s10, %s539_s5  ;;  %p545_p10 = scmp.lt.s32.totalorder %s539_s5, %s539_s5 }
  0x23   :  { %491 = vmatpush3.bf16.msra.mxu0 %v490_v38  ;;  %p546_p11 = por %p545_p10, %p544_p9 }
  0x24   :  { %473 = vmatpush3.bf16.msra.mxu1 %v472_v20  ;;  %492 = vmatprep.subr.bf16.mxu0 %v568_v0 }
  0x25   :  { %474 = vmatprep.subr.bf16.mxu1 %v568_v0  ;;  %p547_p12 = pnand %p546_p11, %p540_p8 }
  0x27   :  { %494 = vmatpush3.bf16.msra.mxu0 %v493_v41 }
  0x28   :  { %476 = vmatpush3.bf16.msra.mxu1 %v475_v23  ;;  %495 = vmatprep.subr.bf16.mxu0 %v568_v0 }
  0x29   :  { %477 = vmatprep.subr.bf16.mxu1 %v568_v0 }
  0x2b   :  { %497 = vmatpush3.bf16.msra.mxu0 %v496_v44 }
  0x2c   :  { %479 = vmatpush3.bf16.msra.mxu1 %v478_v26  ;;  %498 = vmatprep.subr.bf16.mxu0 %v568_v0 }
  0x2d   :  { %480 = vmatprep.subr.bf16.mxu1 %v568_v0 }
  0x2f   :  { %500 = vmatpush3.bf16.msra.mxu0 %v499_v47 }
  0x30   :  { %482 = vmatpush3.bf16.msra.mxu1 %v481_v29  ;;  %501 = vmatprep.subr.bf16.mxu0 %v568_v0 }
  0x31   :  { %483 = vmatprep.subr.bf16.mxu1 %v568_v0 }
  0x33   :  { %503 = vmatpush3.bf16.msra.mxu0 %v502_v50 }
  0x34   :  { %485 = vmatpush3.bf16.msra.mxu1 %v484_v32  ;;  %504 = vmatprep.subr.bf16.mxu0 %v568_v0 }
  0x37   :  { %506 = vmatpush3.bf16.msra.mxu0 %v505_v53 }
  0x38   :  { %507 = vmatprep.subr.bf16.mxu0 %v568_v0 }
  0x3b   :  { %509 = vmatpush3.bf16.msra.mxu0 %v508_v61 }
  0xf1   :  { %v123_v55 = vpop.f32.mrb[0].mxu0 }
  0xf2   :  { %v124_v56 = vadd.f32 %v332_v54, %v123_v55  ;;  %v385_v57 = vpop.f32.mrb[1].mxu0 }
  0xf4   :  { %v127_v58 = vmax.f32 %v124_v56, 0.0 }
  0xf6   :  { %419 = vmatmul.mubr.f32.vlgmr.msra.gmra.mrb[0].mxu1 %v127_v58 }
 0x1c9   :  { %v217_v63 = vpop.f32.mrb[0].mxu1 }
 0x1ca   :  { %v218_v0 = vadd.f32 %v334_v62, %v217_v63  ;;  %v420_v1 = vpop.f32.mrb[1].mxu1 }
 0x1cc   :  { %v221_v2 = vmax.f32 %v218_v0, 0.0 }
 0x1ce   :  { %454 = vmatmul.mubr.f32.vlgmr.msra.gmra.mrb[2].mxu0 %v221_v2 }
 0x2a1   :  { %v311_v4 = vpop.f32.mrb[2].mxu0 }
 0x2a2   :  { %v312_v5 = vadd.f32 %v335_v3, %v311_v4  ;;  %v455_v6 = vpop.f32.mrb[3].mxu0 }
 0x2a4   :  { %316 = vst.msk [vmem:[#allocation5] sm:$0xff] %vm315_vm2, %v312_v5 }
 0x2a5   :  { %550 = shalt.err (!%p547_p12)
}
 0x2a6   :  { %s551_s12 = scalar_lea.hbm %s772_s7, 128 }
 0x2a7   :  { %p552_p13 = scmp.ne.s32.totalorder %s772_s7, %s551_s12  ;;  %p555_p0 = scmp.lt.u32.totalorder %s551_s12, %s772_s7 }
 0x2a9   :  { %p557_p1 = pnand %p555_p0, %p552_p13 }
 0x2ab   :  { %560 = shalt.err (!%p557_p1)
}
 0x2ac   :  { %326 = dma.vmem_to_hbm [thread:$0]  %s324_s10, 128, %s772_s7, [#allocation4]  }
 0x2ad   :  { %563 = dma.done.wait [#allocation4], 128  }
 0x2ae   :  { %564 = vsyncadd [#allocation4], 4294967168 }
 0x2af   :  { %330 = vsyncpa [#allocation3], 1 }
 0x2b0   :  { %331 = vsyncpa [#allocation4], 1 }

</bundles_post_ra>
